<compile_context>
chip_gen: v6e
topology: v6e:2x2x1
jax: 0.10.0
libtpu: 0.0.40
codegen_flags: <defaults>
</compile_context>

<pallas_src>
import functools
import math

import jax
import jax.numpy as jnp
from jax.experimental import pallas as pl
from jax.experimental.pallas import tpu as pltpu


# ---------------------------------------------------------------------------
# Kernel bodies: y = cast(x_f32 * scale_f32 + shift_f32, out_dtype)
# ---------------------------------------------------------------------------
def _ssf_kernel_lane(x_ref, ss_ref, o_ref):
    """scale/shift broadcast over rows. ss_ref is a (2, lane_tile) f32 block."""
    x = x_ref[...].astype(jnp.float32)
    scale = ss_ref[0:1, :]
    shift = ss_ref[1:2, :]
    o_ref[...] = (x * scale + shift).astype(o_ref.dtype)


def _ssf_kernel_row(x_ref, ss_ref, o_ref):
    """scale/shift broadcast over lanes. ss_ref is a (row_tile, 2) f32 block."""
    x = x_ref[...].astype(jnp.float32)
    scale = ss_ref[:, 0:1]
    shift = ss_ref[:, 1:2]
    o_ref[...] = (x * scale + shift).astype(o_ref.dtype)


# ---------------------------------------------------------------------------
# Generation-aware sizing
# ---------------------------------------------------------------------------
_MIB = 1024 * 1024
_GEN_CONFIG = {
    5: dict(target_bytes=2 * _MIB, vmem_cap=48 * _MIB),   # 0.82 TB/s, 16 MiB scoped default
    6: dict(target_bytes=4 * _MIB, vmem_cap=48 * _MIB),   # 1.4  TB/s, 128 MiB VMEM
    7: dict(target_bytes=6 * _MIB, vmem_cap=48 * _MIB),   # 3.2  TB/s, 64 MiB VMEM
}
_GEN_DEFAULT = dict(target_bytes=2 * _MIB, vmem_cap=32 * _MIB)


@functools.lru_cache(maxsize=None)
def _tpu_generation():
    try:
        kind = jax.devices()[0].device_kind.lower()
    except Exception:
        return 0
    for gen in (7, 6, 5, 4, 3):
        if f"v{gen}" in kind:
            return gen
    return 0


def _choose_tiles(rows, lane, itemsize, target_bytes):
    """Byte-targeted (row, lane) tiles; full-extent blocks are always legal."""
    sub = max(8, 32 // itemsize)  # 8 f32 / 16 bf16 / 32 int8-fp8
    # Lane tile: full extent unless even the minimal-sublane block blows the budget.
    if lane <= 128 or lane * itemsize * sub <= target_bytes:
        tile_l = lane
    else:
        tl = (target_bytes // (itemsize * sub)) // 128 * 128
        tile_l = max(128, min(tl, (lane // 128) * 128))
    # Row tile: fill the remaining byte budget, sublane-aligned.
    if rows <= sub:
        tile_r = rows
    else:
        tr = (target_bytes // max(1, tile_l * itemsize)) // sub * sub
        tr = max(sub, tr)
        tile_r = rows if tr >= rows else tr
    return tile_r, tile_l


# ---------------------------------------------------------------------------
# Pallas driver for a (rows, lane) slab
# ---------------------------------------------------------------------------
def _ssf_affine_2d(x2d, params, *, row_broadcast):
    """y = x * scale + shift on a (rows, lane) slab.

    params is f32: (2, lane) when scale/shift broadcast over rows (hidden on
    lanes), or (rows, 2) when they broadcast over lanes (channel on rows).
    """
    rows, lane = x2d.shape
    itemsize = jnp.dtype(x2d.dtype).itemsize
    gen = _tpu_generation()
    cfg = _GEN_CONFIG.get(gen, _GEN_DEFAULT)

    tile_r, tile_l = _choose_tiles(rows, lane, itemsize, cfg["target_bytes"])
    grid = (pl.cdiv(rows, tile_r), pl.cdiv(lane, tile_l))

    x_spec = pl.BlockSpec((tile_r, tile_l), lambda i, j: (i, j))
    if row_broadcast:
        kernel = _ssf_kernel_row
        ss_spec = pl.BlockSpec((tile_r, 2), lambda i, j: (i, 0))
        param_pad_bytes = tile_r * 128 * 4        # (tile_r, 2) pads to 128 lanes
    else:
        kernel = _ssf_kernel_lane
        ss_spec = pl.BlockSpec((2, tile_l), lambda i, j: (0, j))
        param_pad_bytes = 8 * tile_l * 4          # (2, tile_l) pads to 8 sublanes

    # Double-buffered in + out blocks + double-buffered padded param + headroom.
    block_bytes = tile_r * tile_l * itemsize
    vmem_est = 6 * block_bytes + 2 * param_pad_bytes + 2 * _MIB
    vmem_limit = int(min(cfg["vmem_cap"], max(16 * _MIB, vmem_est)))

    # v7x has 2 TensorCores: shard the row axis across them when there is work
    # to split; elsewhere plain "parallel" (near-neutral vs "arbitrary").
    if gen >= 7 and grid[0] >= 2 and hasattr(pltpu, "CORE_PARALLEL"):
        dims = (pltpu.CORE_PARALLEL, pltpu.PARALLEL)
    else:
        dims = ("parallel", "parallel")

    return pl.pallas_call(
        kernel,
        out_shape=jax.ShapeDtypeStruct((rows, lane), x2d.dtype),
        grid_spec=pltpu.PrefetchScalarGridSpec(
            num_scalar_prefetch=0,
            grid=grid,
            in_specs=[x_spec, ss_spec],
            out_specs=pl.BlockSpec((tile_r, tile_l), lambda i, j: (i, j)),
        ),
        compiler_params=pltpu.CompilerParams(
            dimension_semantics=dims,
            vmem_limit_bytes=vmem_limit,
        ),
    )(x2d, params)


def _ssf_reference(x, scale_f32, shift_f32):
    """Plain-JAX fallback (tiny inputs) with the same f32-compute semantics."""
    ndim = x.ndim
    if ndim in (2, 3):
        bshape = (1,) * (ndim - 1) + (-1,)
    else:
        bshape = (1, -1) + (1,) * (ndim - 2)
    y = x.astype(jnp.float32) * scale_f32.reshape(bshape) + shift_f32.reshape(bshape)
    return y.astype(x.dtype)


def ssf_layer(x, scale, shift, *, min_pallas_elements=131072):
    """JAX/Pallas equivalent of SSFLayer.forward.

    scale/shift have shape (hidden_size,).  For 2-D / 3-D inputs hidden is the
    last dim; for 4-D (NCHW) / 5-D (NCDHW) inputs it is dim 1 (channels),
    matching the PyTorch module's broadcasting.  Parameters stay in f32 and the
    affine transform is computed in f32, casting back to x.dtype on store.
    """
    scale_f32 = jnp.asarray(scale, jnp.float32)
    shift_f32 = jnp.asarray(shift, jnp.float32)
    ndim = x.ndim
    if ndim not in (2, 3, 4, 5):
        raise ValueError(f"Unsupported input dimension: {ndim}, shape: {x.shape}")

    # Tiny inputs: pallas_call dispatch + pipeline prologue dwarfs the work.
    if x.size <= min_pallas_elements:
        return _ssf_reference(x, scale_f32, shift_f32)

    if ndim in (2, 3):
        H = x.shape[-1]
        rows = x.size // H
        x2d = x.reshape(rows, H)
        sc, sh = scale_f32, shift_f32
        # Lane-folding: keep stores unmasked when H is not a multiple of 128.
        if H % 128 != 0:
            k = 128 // math.gcd(H, 128)
            if k > 1 and rows % k == 0:
                x2d = x2d.reshape(rows // k, k * H)
                sc = jnp.tile(scale_f32, k)
                sh = jnp.tile(shift_f32, k)
        params = jnp.stack([sc, sh], axis=0)               # (2, lane) f32
        out = _ssf_affine_2d(x2d, params, row_broadcast=False)
        return out.reshape(x.shape)

    # 4-D NCHW / 5-D NCDHW kept in native layout: rows = N*C, lanes = spatial.
    N, C = x.shape[0], x.shape[1]
    rows = N * C
    lane = x.size // rows
    sc = jnp.broadcast_to(scale_f32[None, :], (N, C)).reshape(rows)
    sh = jnp.broadcast_to(shift_f32[None, :], (N, C)).reshape(rows)
    params = jnp.stack([sc, sh], axis=1)                   # (rows, 2) f32
    out = _ssf_affine_2d(x.reshape(rows, lane), params, row_broadcast=True)
    return out.reshape(x.shape)


if __name__ == "__main__":
    key = jax.random.PRNGKey(0)
    k1, k2, k3, k4, k5, k6 = jax.random.split(key, 6)

    # --- canonical small 4-D NCHW case (tiny-input bypass path) ---
    C = 4
    scale_c = jnp.ones((C,), jnp.float32) * 1.5
    shift_c = jnp.ones((C,), jnp.float32) * -0.25
    x4 = jax.random.normal(k1, (2, C, 16, 16), jnp.float32)
    y4 = jax.block_until_ready(ssf_layer(x4, scale_c, shift_c))
    ref4 = x4 * scale_c.reshape(1, -1, 1, 1) + shift_c.reshape(1, -1, 1, 1)
    assert jnp.allclose(y4, ref4, atol=1e-6), "4D (small) mismatch"

    # same small shape forced through the Pallas row-broadcast kernel
    y4p = jax.block_until_ready(ssf_layer(x4, scale_c, shift_c, min_pallas_elements=0))
    assert jnp.allclose(y4p, ref4, atol=1e-6), "4D (forced pallas) mismatch"

    # --- small 2-D / 3-D, hidden=32 ---
    Hd = 32
    scale_h = jnp.ones((Hd,), jnp.float32) * 2.0
    shift_h = jnp.ones((Hd,), jnp.float32) * 0.5
    x2 = jax.random.normal(k2, (2, Hd), jnp.float32)
    y2 = jax.block_until_ready(ssf_layer(x2, scale_h, shift_h))
    assert jnp.allclose(y2, x2 * scale_h + shift_h, atol=1e-6), "2D mismatch"
    y2p = jax.block_until_ready(ssf_layer(x2, scale_h, shift_h, min_pallas_elements=0))
    assert jnp.allclose(y2p, x2 * scale_h + shift_h, atol=1e-6), "2D (forced pallas) mismatch"

    x3 = jax.random.normal(k3, (2, 8, Hd), jnp.float32)
    y3 = jax.block_until_ready(ssf_layer(x3, scale_h, shift_h))
    assert jnp.allclose(y3, x3 * scale_h + shift_h, atol=1e-6), "3D mismatch"

    # --- 3-D with H=32 whose rows fold into 128-wide lanes (forced pallas) ---
    x3f = jax.random.normal(k3, (8, 16, Hd), jnp.float32)
    y3f = jax.block_until_ready(ssf_layer(x3f, scale_h, shift_h, min_pallas_elements=0))
    assert jnp.allclose(y3f, x3f * scale_h + shift_h, atol=1e-6), "3D (lane-fold) mismatch"

    # --- 3-D big enough for the natural Pallas lane-broadcast path (multi row-block) ---
    Hb = 512
    scale_b = jax.random.normal(k5, (Hb,), jnp.float32) * 0.1 + 1.0
    shift_b = jax.random.normal(k6, (Hb,), jnp.float32) * 0.1
    x3b = jax.random.normal(k4, (2, 2048, Hb), jnp.float32)
    y3b = jax.block_until_ready(ssf_layer(x3b, scale_b, shift_b))
    ref3b = x3b * scale_b[None, None, :] + shift_b[None, None, :]
    assert jnp.allclose(y3b, ref3b, atol=1e-5), "3D (pallas) mismatch"

    # --- 4-D with a big spatial extent: exercises the lane-tiled grid axis ---
    scale_c4 = jax.random.normal(k5, (C,), jnp.float32) * 0.1 + 1.0
    shift_c4 = jax.random.normal(k6, (C,), jnp.float32) * 0.1
    x4b = jax.random.normal(k2, (1, C, 512, 512), jnp.float32)
    y4b = jax.block_until_ready(ssf_layer(x4b, scale_c4, shift_c4))
    ref4b = x4b * scale_c4.reshape(1, -1, 1, 1) + shift_c4.reshape(1, -1, 1, 1)
    assert jnp.allclose(y4b, ref4b, atol=1e-5), "4D (lane-tiled pallas) mismatch"

    # --- 5-D NCDHW (forced pallas, row-broadcast, no transpose) ---
    x5 = jax.random.normal(k3, (2, C, 4, 16, 16), jnp.float32)
    y5 = jax.block_until_ready(ssf_layer(x5, scale_c4, shift_c4, min_pallas_elements=0))
    ref5 = x5 * scale_c4.reshape(1, -1, 1, 1, 1) + shift_c4.reshape(1, -1, 1, 1, 1)
    assert jnp.allclose(y5, ref5, atol=1e-6), "5D mismatch"

    # --- bf16 input: f32 compute inside kernel, cast on store ---
    x3h = jax.random.normal(k2, (2, 256, Hb), jnp.bfloat16)
    y3h = jax.block_until_ready(ssf_layer(x3h, scale_b, shift_b))
    ref3h = (x3h.astype(jnp.float32) * scale_b + shift_b).astype(jnp.bfloat16)
    assert jnp.allclose(
        y3h.astype(jnp.float32), ref3h.astype(jnp.float32), atol=1e-2
    ), "3D bf16 mismatch"

    print("KERNEL_OK")
</pallas_src>

<mosaic_0001>
module attributes {stable_mosaic.version = 11 : i64} {
  func.func @_ssf_kernel_row(%arg0: i32, %arg1: i32, %arg2: memref<8x256xf32, #tpu.memory_space<vmem>>, %arg3: memref<8x2xf32, #tpu.memory_space<vmem>>, %arg4: memref<8x256xf32, #tpu.memory_space<vmem>>) attributes {dimension_semantics = [#tpu.dimension_semantics<parallel>, #tpu.dimension_semantics<parallel>], iteration_bounds = array<i64: 1, 1>, scalar_prefetch = 0 : i64, scratch_operands = 0 : i64, tpu.core_type = #tpu.core_type<tc>, window_params = [{transform_indices = @transform_0, window_bounds = array<i64: 8, 256>}, {transform_indices = @transform_1, window_bounds = array<i64: 8, 2>}, {transform_indices = @transform_2, window_bounds = array<i64: 8, 256>}]} {
    %c0 = arith.constant 0 : index
    %c0_0 = arith.constant 0 : index
    %0 = vector.load %arg2[%c0, %c0_0] : memref<8x256xf32, #tpu.memory_space<vmem>>, vector<8x256xf32>
    %c0_1 = arith.constant 0 : index
    %c0_2 = arith.constant 0 : index
    %1 = vector.load %arg3[%c0_1, %c0_2] : memref<8x2xf32, #tpu.memory_space<vmem>>, vector<8x1xf32>
    %c0_3 = arith.constant 0 : index
    %c1 = arith.constant 1 : index
    %2 = vector.load %arg3[%c0_3, %c1] : memref<8x2xf32, #tpu.memory_space<vmem>>, vector<8x1xf32>
    %3 = vector.broadcast %1 : vector<8x1xf32> to vector<8x256xf32>
    %4 = arith.mulf %0, %3 : vector<8x256xf32>
    %5 = vector.broadcast %2 : vector<8x1xf32> to vector<8x256xf32>
    %6 = arith.addf %4, %5 : vector<8x256xf32>
    %c0_4 = arith.constant 0 : index
    %c0_5 = arith.constant 0 : index
    %7 = vector.load %arg4[%c0_4, %c0_5] : memref<8x256xf32, #tpu.memory_space<vmem>>, vector<8x256xf32>
    tpu.vector_store %arg4[%c0_4, %c0_5], %6 {strides = array<i32>} : memref<8x256xf32, #tpu.memory_space<vmem>>, vector<8x256xf32>,
    return
  }
  func.func @transform_0(%arg0: i32, %arg1: i32) -> (i32, i32) {
    %c0_i32 = arith.constant 0 : i32
    return %arg0, %arg1 : i32, i32
  }
  func.func @transform_1(%arg0: i32, %arg1: i32) -> (i32, i32) {
    %c0_i32 = arith.constant 0 : i32
    %c0_i32_0 = arith.constant 0 : i32
    return %arg0, %c0_i32 : i32, i32
  }
  func.func @transform_2(%arg0: i32, %arg1: i32) -> (i32, i32) {
    %c0_i32 = arith.constant 0 : i32
    return %arg0, %arg1 : i32, i32
  }
}

</mosaic_0001>

<bundles_post_ra>
// kernel: tpu_custom_call.1
= control target key start
LH: loop header
LB: loop body
LE: loop exit
PB: predicated region body
PF: predicated region fallthrough
CT: control target
= control target key end

     0   :  { %7 = vsyncpa [#allocation3], 0  ;;  %s135_s0 = inlined_call_operand.hbm [shape: f32[8,256], index: 0, kind: input, shape index: {}]   ;;  %s136_s1 = inlined_call_operand.vmem [shape: f32[8,2], index: 1, kind: input, shape index: {}]   ;;  %s137_s2 = inlined_call_operand.hbm [shape: f32[8,256], index: 2, kind: output, shape index: {}]  }
   0x1   :  { %8 = vsyncpa [#allocation4], 0  ;;  %s107_s9 = smov [#allocation2]  }
   0x2   :  { %s15_s10 = sshll.u32 %s107_s9, 4  ;;  %s16_s10 = int_to_ptr.vmem [resolvable:$true] %s15_s10 }
   0x3   :  { %s71_s11 = scalar_lea.vmem %s16_s10, 256  ;;  %p76_p1 = scmp.lt.s32.totalorder %s16_s10, %s16_s10 }
   0x4   :  { %p72_p0 = scmp.ne.s32.totalorder %s16_s10, %s71_s11  ;;  %p77_p2 = scmp.lt.s32.totalorder %s71_s11, %s71_s11 }
   0x6   :  { %p78_p3 = por %p77_p2, %p76_p1 }
   0x8   :  { %p79_p4 = pnand %p78_p3, %p72_p0 }
   0xa   :  { %82 = shalt.err (!%p79_p4)
}
   0xb   :  { %18 = dma.hbm_to_vmem [thread:$0]  %s135_s0, 256, %s16_s10, [#allocation3]  }
   0xc   :  { %103 = dma.done.wait [#allocation3], 256  }
   0xd   :  { %104 = vsyncadd [#allocation3], 4294967040  ;;  %v108_v0 = vmov 0   ;;  %v26_v1 = vld [vmem:[%s136_s1] sm:$0xff]  ;;  %v109_v2 = vmov 1   ;;  %v25_v5 = vld [vmem:[#allocation2 + $0x8] sm:$0xff] }
   0xe   :  { %61 = vset.pattern.permute.xlu0 %v108_v0  ;;  %v24_v4 = vld [vmem:[#allocation2] sm:$0xff]  ;;  %s110_s16 = smov [#allocation5]  }
   0xf   :  { %29 = vperm.xlu0 %61, %v26_v1   ;;  %s48_s17 = sshll.u32 %s110_s16, 4  ;;  %s49_s17 = int_to_ptr.vmem [resolvable:$true] %s48_s17 }
  0x10   :  { %s83_s0 = scalar_lea.vmem %s49_s17, 256  ;;  %p88_p6 = scmp.lt.s32.totalorder %s49_s17, %s49_s17 }
  0x11   :  { %p84_p5 = scmp.ne.s32.totalorder %s49_s17, %s83_s0  ;;  %p89_p7 = scmp.lt.s32.totalorder %s83_s0, %s83_s0 }
  0x13   :  { %62 = vset.pattern.permute.xlu0 %v109_v2  ;;  %p90_p8 = por %p89_p7, %p88_p6 }
  0x14   :  { %35 = vperm.xlu0 %62, %v26_v1  }
  0x15   :  { %p91_p9 = pnand %p90_p8, %p84_p5 }
  0x8a   :  { %v30_v3 = vpop.permute.xlu0 %29 }
  0x8b   :  { %v32_v6 = vmul.f32 %v30_v3, %v24_v4  ;;  %v33_v7 = vmul.f32 %v30_v3, %v25_v5 }
  0x8f   :  { %v36_v8 = vpop.permute.xlu0 %35 }
  0x90   :  { %v38_v9 = vadd.f32 %v36_v8, %v32_v6  ;;  %v39_v10 = vadd.f32 %v36_v8, %v33_v7 }
  0x92   :  { %40 = vst [vmem:[#allocation5] sm:$0xff] %v38_v9  ;;  %41 = vst [vmem:[#allocation5 + $0x8] sm:$0xff] %v39_v10 }
  0x93   :  { %94 = shalt.err (!%p91_p9)
}
  0x94   :  { %51 = dma.vmem_to_hbm [thread:$0]  %s49_s17, 256, %s137_s2, [#allocation4]  }
  0x95   :  { %105 = dma.done.wait [#allocation4], 256  }
  0x96   :  { %106 = vsyncadd [#allocation4], 4294967040 }
  0x97   :  { %55 = vsyncpa [#allocation3], 1 }
  0x98   :  { %56 = vsyncpa [#allocation4], 1 }

</bundles_post_ra>
